<compile_context>
chip_gen: v5e
topology: v5e:2x2
jax: 0.10.0
libtpu: 0.0.40
codegen_flags: <defaults>
</compile_context>

<pallas_src>
import numpy as np
import jax
import jax.numpy as jnp
from jax import lax
from jax.experimental import pallas as pl
from jax.experimental.pallas import tpu as pltpu


# ----------------------------------------------------------------------------
# Pallas kernel
# ----------------------------------------------------------------------------
def ssd_kernel(x_ref,
               w1_ref, b1_ref, w2_ref, b2_ref, w3_ref, b3_ref,
               wloc_ref, bloc_ref, wcls_ref, bcls_ref,
               loc_ref, cls_ref):
    """Fused SSD forward (3x Conv1d(k=3,pad=1)+ReLU, then loc/cls heads).

    x_ref:            (B, L, Cin) input (channels-last)
    w*_ref:           (3*Cin, Cout) im2col-packed conv weights (tap-major rows)
    b*_ref:           (1, Cout) biases
    loc_ref, cls_ref: (B*L, A) head outputs (anchor index fastest)
    """
    B, L, Cin = x_ref.shape
    R = B * L

    # Boundary masks, built once and reused by all four conv layers.  The
    # rolls below wrap around across window / batch boundaries; these masks
    # zero exactly the wrapped rows, recovering zero-padding semantics.
    row = lax.broadcasted_iota(jnp.int32, (R, 1), 0)
    pos = row % L
    mask_first = (pos != 0).astype(jnp.float32)        # kills h[l-1] at l == 0
    mask_last = (pos != (L - 1)).astype(jnp.float32)   # kills h[l+1] at l == L-1

    def im2col(h):
        # h: (R, C) -> (R, 3C) columns [prev | cur | next], all in registers
        # (XLU sublane rolls + VPU masks, no VMEM staging round-trip).
        prev = pltpu.roll(h, shift=1, axis=0) * mask_first
        nxt = pltpu.roll(h, shift=R - 1, axis=0) * mask_last
        return jnp.concatenate([prev, h, nxt], axis=-1)

    def conv(h, w_ref, b_ref):
        # (R, 3C) x (3C, Cout) on the MXU, f32 accumulation.
        return jnp.dot(im2col(h), w_ref[...],
                       preferred_element_type=jnp.float32) + b_ref[...]

    x = x_ref[...].reshape(R, Cin)                       # free vreg re-index
    h = jnp.maximum(conv(x, w1_ref, b1_ref), 0.0)        # (R, 32)
    h = jnp.maximum(conv(h, w2_ref, b2_ref), 0.0)        # (R, 32)
    h = jnp.maximum(conv(h, w3_ref, b3_ref), 0.0)        # (R, 32)

    cols = im2col(h)                                     # shared by both heads
    loc_ref[...] = jnp.dot(cols, wloc_ref[...],
                           preferred_element_type=jnp.float32) + bloc_ref[...]
    cls_ref[...] = jnp.dot(cols, wcls_ref[...],
                           preferred_element_type=jnp.float32) + bcls_ref[...]


# ----------------------------------------------------------------------------
# Wrapper
# ----------------------------------------------------------------------------
def pack_params(params):
    """One-time weight packing (kept OUT of the per-call hot path).

    Conv weights come in as (K=3, Cin, Cout); flatten to (3*Cin, Cout) with
    tap-major rows, matching the [prev | cur | next] im2col column order.
    """
    (w1, b1, w2, b2, w3, b3, wloc, bloc, wcls, bcls) = params
    to2d = lambda w: w.reshape(w.shape[0] * w.shape[1], w.shape[2])
    return (to2d(w1), b1, to2d(w2), b2, to2d(w3), b3,
            to2d(wloc), bloc, to2d(wcls), bcls)


@jax.jit
def ssd_forward(x, packed):
    """x: (B, L, feature_dim) float32; packed: output of pack_params.

    Returns (loc_pred (B, L*A, 1), cls_pred (B, L*A)) matching the PyTorch
    module's permute(0,2,1).view(...) semantics (anchor index fastest).
    """
    B, L, _ = x.shape
    A = packed[7].shape[-1]          # bloc: (1, A)

    loc2d, cls2d = pl.pallas_call(
        ssd_kernel,
        out_shape=(jax.ShapeDtypeStruct((B * L, A), jnp.float32),
                   jax.ShapeDtypeStruct((B * L, A), jnp.float32)),
    )(x, *packed)

    # Contiguous reshapes (free): row index is b*L + l, lane index is a,
    # so flattening gives the anchor-fastest (B, L*A) ordering directly.
    return loc2d.reshape(B, L * A, 1), cls2d.reshape(B, L * A)


def generate_anchors(window_size, anchor_scales):
    anchors = []
    for pos in range(window_size):
        for scale in anchor_scales:
            center = (pos + 0.5) / window_size
            span = int(scale * window_size)
            anchors.append([center, span])
    return jnp.asarray(np.array(anchors, dtype=np.float32))


def init_params(key, feature_dim, num_anchors):
    """Deterministic synthetic parameters.

    Conv1d weights are stored as (K=3, Cin, Cout) — i.e. PyTorch's
    (Cout, Cin, K) transposed to (K, Cin, Cout) — biases as (1, Cout).
    Tap k=0 multiplies x[l-1], k=1 -> x[l], k=2 -> x[l+1] (padding=1).
    """
    def conv_params(key, cin, cout):
        kw, kb = jax.random.split(key)
        w = jax.random.normal(kw, (3, cin, cout), jnp.float32) * 0.1
        b = jax.random.normal(kb, (1, cout), jnp.float32) * 0.1
        return w, b

    keys = jax.random.split(key, 5)
    w1, b1 = conv_params(keys[0], feature_dim, 32)
    w2, b2 = conv_params(keys[1], 32, 32)
    w3, b3 = conv_params(keys[2], 32, 32)
    wloc, bloc = conv_params(keys[3], 32, num_anchors)
    wcls, bcls = conv_params(keys[4], 32, num_anchors)
    return (w1, b1, w2, b2, w3, b3, wloc, bloc, wcls, bcls)


# ----------------------------------------------------------------------------
# Plain-JAX reference (for validation only)
# ----------------------------------------------------------------------------
def _ref_conv1d(x_blc, w_kio, b):
    y = lax.conv_general_dilated(
        x_blc, w_kio, window_strides=(1,), padding=((1, 1),),
        dimension_numbers=("NWC", "WIO", "NWC"))
    return y + b[None, :, :]


def ssd_forward_ref(x, params):
    (w1, b1, w2, b2, w3, b3, wloc, bloc, wcls, bcls) = params
    h = jax.nn.relu(_ref_conv1d(x, w1, b1))
    h = jax.nn.relu(_ref_conv1d(h, w2, b2))
    h = jax.nn.relu(_ref_conv1d(h, w3, b3))
    loc = _ref_conv1d(h, wloc, bloc)
    cls = _ref_conv1d(h, wcls, bcls)
    B, L, A = loc.shape
    return loc.reshape(B, L * A, 1), cls.reshape(B, L * A)


# ----------------------------------------------------------------------------
if __name__ == "__main__":
    B = 2
    window_size = 16          # L
    feature_dim = 4           # input channels
    anchor_scales = [0.17, 0.5, 1.0]
    num_anchors = len(anchor_scales)

    key = jax.random.PRNGKey(0)
    k_x, k_p = jax.random.split(key)
    x = jax.random.normal(k_x, (B, window_size, feature_dim), jnp.float32)
    params = init_params(k_p, feature_dim, num_anchors)
    packed = jax.tree_util.tree_map(jax.block_until_ready,
                                    pack_params(params))   # one-time packing
    anchors = generate_anchors(window_size, anchor_scales)

    loc_pred, cls_pred = ssd_forward(x, packed)
    loc_pred = jax.block_until_ready(loc_pred)
    cls_pred = jax.block_until_ready(cls_pred)

    # Validate against a plain-JAX conv reference.
    loc_ref, cls_ref = ssd_forward_ref(x, params)
    assert loc_pred.shape == (B, window_size * num_anchors, 1)
    assert cls_pred.shape == (B, window_size * num_anchors)
    assert anchors.shape == (window_size * num_anchors, 2)
    np.testing.assert_allclose(np.asarray(loc_pred), np.asarray(loc_ref),
                               rtol=1e-4, atol=1e-4)
    np.testing.assert_allclose(np.asarray(cls_pred), np.asarray(cls_ref),
                               rtol=1e-4, atol=1e-4)

    print("KERNEL_OK")
</pallas_src>

<mosaic_0001>
module attributes {stable_mosaic.version = 11 : i64} {
  func.func @ssd_kernel(%arg0: memref<2x16x4xf32, #tpu.memory_space<vmem>>, %arg1: memref<12x32xf32, #tpu.memory_space<vmem>>, %arg2: memref<1x32xf32, #tpu.memory_space<vmem>>, %arg3: memref<96x32xf32, #tpu.memory_space<vmem>>, %arg4: memref<1x32xf32, #tpu.memory_space<vmem>>, %arg5: memref<96x32xf32, #tpu.memory_space<vmem>>, %arg6: memref<1x32xf32, #tpu.memory_space<vmem>>, %arg7: memref<96x3xf32, #tpu.memory_space<vmem>>, %arg8: memref<1x3xf32, #tpu.memory_space<vmem>>, %arg9: memref<96x3xf32, #tpu.memory_space<vmem>>, %arg10: memref<1x3xf32, #tpu.memory_space<vmem>>, %arg11: memref<32x3xf32, #tpu.memory_space<vmem>>, %arg12: memref<32x3xf32, #tpu.memory_space<vmem>>) attributes {dimension_semantics = [], scalar_prefetch = 0 : i64, scratch_operands = 0 : i64, tpu.core_type = #tpu.core_type<tc>} {
    %0 = tpu.iota {dimensions = array<i32: 0>} : vector<32x1xi32>
    %c16_i32 = arith.constant 16 : i32
    %c0_i32 = arith.constant 0 : i32
    %1 = arith.cmpi eq, %c16_i32, %c0_i32 : i32
    %c1_i32 = arith.constant 1 : i32
    %2 = arith.select %1, %c1_i32, %c16_i32 : i32
    %3 = vector.broadcast %2 : i32 to vector<32x1xi32>
    %4 = arith.remsi %0, %3 : vector<32x1xi32>
    %c0_i32_0 = arith.constant 0 : i32
    %5 = vector.broadcast %c0_i32_0 : i32 to vector<32x1xi32>
    %6 = arith.cmpi ne, %4, %5 : vector<32x1xi32>
    %c0_i32_1 = arith.constant 0 : i32
    %7 = vector.broadcast %c0_i32_1 : i32 to vector<32x1xi32>
    %8 = arith.cmpi slt, %4, %7 : vector<32x1xi32>
    %c0_i32_2 = arith.constant 0 : i32
    %9 = arith.cmpi slt, %2, %c0_i32_2 : i32
    %10 = vector.broadcast %9 : i1 to vector<32x1xi1>
    %11 = vector.broadcast %10 : vector<32x1xi1> to vector<32x1xi1>
    %12 = arith.xori %8, %11 : vector<32x1xi1>
    %13 = arith.andi %12, %6 : vector<32x1xi1>
    %14 = vector.broadcast %2 : i32 to vector<32x1xi32>
    %15 = arith.addi %4, %14 : vector<32x1xi32>
    %16 = arith.select %13, %15, %4 : vector<32x1xi1>, vector<32x1xi32>
    %c0_i32_3 = arith.constant 0 : i32
    %17 = vector.broadcast %c0_i32_3 : i32 to vector<32x1xi32>
    %18 = arith.cmpi ne, %16, %17 : vector<32x1xi32>
    %19 = arith.extui %18 : vector<32x1xi1> to vector<32x1xi32>
    %20 = arith.sitofp %19 : vector<32x1xi32> to vector<32x1xf32>
    %c15_i32 = arith.constant 15 : i32
    %21 = vector.broadcast %c15_i32 : i32 to vector<32x1xi32>
    %22 = arith.cmpi ne, %16, %21 : vector<32x1xi32>
    %23 = arith.extui %22 : vector<32x1xi1> to vector<32x1xi32>
    %24 = arith.sitofp %23 : vector<32x1xi32> to vector<32x1xf32>
    %c0 = arith.constant 0 : index
    %c0_4 = arith.constant 0 : index
    %c0_5 = arith.constant 0 : index
    %25 = vector.load %arg0[%c0, %c0_4, %c0_5] : memref<2x16x4xf32, #tpu.memory_space<vmem>>, vector<2x16x4xf32>
    %26 = vector.shape_cast %25 : vector<2x16x4xf32> to vector<32x4xf32>
    %c1_i32_6 = arith.constant 1 : i32
    %27 = tpu.dynamic_rotate %26 by %c1_i32_6 dim 0 : vector<32x4xf32>, i32 -> vector<32x4xf32>
    %28 = vector.broadcast %20 : vector<32x1xf32> to vector<32x4xf32>
    %29 = arith.mulf %27, %28 : vector<32x4xf32>
    %c31_i32 = arith.constant 31 : i32
    %30 = tpu.dynamic_rotate %26 by %c31_i32 dim 0 : vector<32x4xf32>, i32 -> vector<32x4xf32>
    %31 = vector.broadcast %24 : vector<32x1xf32> to vector<32x4xf32>
    %32 = arith.mulf %30, %31 : vector<32x4xf32>
    %33 = tpu.concatenate %29, %26, %32 in 1 : vector<32x4xf32>, vector<32x4xf32>, vector<32x4xf32> -> vector<32x12xf32>
    %c0_7 = arith.constant 0 : index
    %c0_8 = arith.constant 0 : index
    %34 = vector.load %arg1[%c0_7, %c0_8] : memref<12x32xf32, #tpu.memory_space<vmem>>, vector<12x32xf32>
    %cst = arith.constant dense<0.000000e+00> : vector<32x32xf32>
    %35 = tpu.matmul %33, %34, %cst {dimension_numbers = #tpu.dot_dimension_numbers<[1], [0], [0], [1], [0, 0, 1, 1], [], []>} : vector<32x12xf32>, vector<12x32xf32>, vector<32x32xf32> -> vector<32x32xf32>
    %c0_9 = arith.constant 0 : index
    %c0_10 = arith.constant 0 : index
    %36 = vector.load %arg2[%c0_9, %c0_10] : memref<1x32xf32, #tpu.memory_space<vmem>>, vector<1x32xf32>
    %37 = vector.broadcast %36 : vector<1x32xf32> to vector<32x32xf32>
    %38 = arith.addf %35, %37 : vector<32x32xf32>
    %cst_11 = arith.constant 0.000000e+00 : f32
    %39 = vector.broadcast %cst_11 : f32 to vector<32x32xf32>
    %40 = arith.maximumf %38, %39 : vector<32x32xf32>
    %c1_i32_12 = arith.constant 1 : i32
    %41 = tpu.dynamic_rotate %40 by %c1_i32_12 dim 0 : vector<32x32xf32>, i32 -> vector<32x32xf32>
    %42 = vector.broadcast %20 : vector<32x1xf32> to vector<32x32xf32>
    %43 = arith.mulf %41, %42 : vector<32x32xf32>
    %c31_i32_13 = arith.constant 31 : i32
    %44 = tpu.dynamic_rotate %40 by %c31_i32_13 dim 0 : vector<32x32xf32>, i32 -> vector<32x32xf32>
    %45 = vector.broadcast %24 : vector<32x1xf32> to vector<32x32xf32>
    %46 = arith.mulf %44, %45 : vector<32x32xf32>
    %47 = tpu.concatenate %43, %40, %46 in 1 : vector<32x32xf32>, vector<32x32xf32>, vector<32x32xf32> -> vector<32x96xf32>
    %c0_14 = arith.constant 0 : index
    %c0_15 = arith.constant 0 : index
    %48 = vector.load %arg3[%c0_14, %c0_15] : memref<96x32xf32, #tpu.memory_space<vmem>>, vector<96x32xf32>
    %cst_16 = arith.constant dense<0.000000e+00> : vector<32x32xf32>
    %49 = tpu.matmul %47, %48, %cst_16 {dimension_numbers = #tpu.dot_dimension_numbers<[1], [0], [0], [1], [0, 0, 1, 1], [], []>} : vector<32x96xf32>, vector<96x32xf32>, vector<32x32xf32> -> vector<32x32xf32>
    %c0_17 = arith.constant 0 : index
    %c0_18 = arith.constant 0 : index
    %50 = vector.load %arg4[%c0_17, %c0_18] : memref<1x32xf32, #tpu.memory_space<vmem>>, vector<1x32xf32>
    %51 = vector.broadcast %50 : vector<1x32xf32> to vector<32x32xf32>
    %52 = arith.addf %49, %51 : vector<32x32xf32>
    %cst_19 = arith.constant 0.000000e+00 : f32
    %53 = vector.broadcast %cst_19 : f32 to vector<32x32xf32>
    %54 = arith.maximumf %52, %53 : vector<32x32xf32>
    %c1_i32_20 = arith.constant 1 : i32
    %55 = tpu.dynamic_rotate %54 by %c1_i32_20 dim 0 : vector<32x32xf32>, i32 -> vector<32x32xf32>
    %56 = vector.broadcast %20 : vector<32x1xf32> to vector<32x32xf32>
    %57 = arith.mulf %55, %56 : vector<32x32xf32>
    %c31_i32_21 = arith.constant 31 : i32
    %58 = tpu.dynamic_rotate %54 by %c31_i32_21 dim 0 : vector<32x32xf32>, i32 -> vector<32x32xf32>
    %59 = vector.broadcast %24 : vector<32x1xf32> to vector<32x32xf32>
    %60 = arith.mulf %58, %59 : vector<32x32xf32>
    %61 = tpu.concatenate %57, %54, %60 in 1 : vector<32x32xf32>, vector<32x32xf32>, vector<32x32xf32> -> vector<32x96xf32>
    %c0_22 = arith.constant 0 : index
    %c0_23 = arith.constant 0 : index
    %62 = vector.load %arg5[%c0_22, %c0_23] : memref<96x32xf32, #tpu.memory_space<vmem>>, vector<96x32xf32>
    %cst_24 = arith.constant dense<0.000000e+00> : vector<32x32xf32>
    %63 = tpu.matmul %61, %62, %cst_24 {dimension_numbers = #tpu.dot_dimension_numbers<[1], [0], [0], [1], [0, 0, 1, 1], [], []>} : vector<32x96xf32>, vector<96x32xf32>, vector<32x32xf32> -> vector<32x32xf32>
    %c0_25 = arith.constant 0 : index
    %c0_26 = arith.constant 0 : index
    %64 = vector.load %arg6[%c0_25, %c0_26] : memref<1x32xf32, #tpu.memory_space<vmem>>, vector<1x32xf32>
    %65 = vector.broadcast %64 : vector<1x32xf32> to vector<32x32xf32>
    %66 = arith.addf %63, %65 : vector<32x32xf32>
    %cst_27 = arith.constant 0.000000e+00 : f32
    %67 = vector.broadcast %cst_27 : f32 to vector<32x32xf32>
    %68 = arith.maximumf %66, %67 : vector<32x32xf32>
    %c1_i32_28 = arith.constant 1 : i32
    %69 = tpu.dynamic_rotate %68 by %c1_i32_28 dim 0 : vector<32x32xf32>, i32 -> vector<32x32xf32>
    %70 = vector.broadcast %20 : vector<32x1xf32> to vector<32x32xf32>
    %71 = arith.mulf %69, %70 : vector<32x32xf32>
    %c31_i32_29 = arith.constant 31 : i32
    %72 = tpu.dynamic_rotate %68 by %c31_i32_29 dim 0 : vector<32x32xf32>, i32 -> vector<32x32xf32>
    %73 = vector.broadcast %24 : vector<32x1xf32> to vector<32x32xf32>
    %74 = arith.mulf %72, %73 : vector<32x32xf32>
    %75 = tpu.concatenate %71, %68, %74 in 1 : vector<32x32xf32>, vector<32x32xf32>, vector<32x32xf32> -> vector<32x96xf32>
    %c0_30 = arith.constant 0 : index
    %c0_31 = arith.constant 0 : index
    %76 = vector.load %arg7[%c0_30, %c0_31] : memref<96x3xf32, #tpu.memory_space<vmem>>, vector<96x3xf32>
    %cst_32 = arith.constant dense<0.000000e+00> : vector<32x3xf32>
    %77 = tpu.matmul %75, %76, %cst_32 {dimension_numbers = #tpu.dot_dimension_numbers<[1], [0], [0], [1], [0, 0, 1, 1], [], []>} : vector<32x96xf32>, vector<96x3xf32>, vector<32x3xf32> -> vector<32x3xf32>
    %c0_33 = arith.constant 0 : index
    %c0_34 = arith.constant 0 : index
    %78 = vector.load %arg8[%c0_33, %c0_34] : memref<1x3xf32, #tpu.memory_space<vmem>>, vector<1x3xf32>
    %79 = vector.broadcast %78 : vector<1x3xf32> to vector<32x3xf32>
    %80 = arith.addf %77, %79 : vector<32x3xf32>
    %c0_35 = arith.constant 0 : index
    %c0_36 = arith.constant 0 : index
    %81 = vector.load %arg11[%c0_35, %c0_36] : memref<32x3xf32, #tpu.memory_space<vmem>>, vector<32x3xf32>
    tpu.vector_store %arg11[%c0_35, %c0_36], %80 {strides = array<i32>} : memref<32x3xf32, #tpu.memory_space<vmem>>, vector<32x3xf32>,
    %c0_37 = arith.constant 0 : index
    %c0_38 = arith.constant 0 : index
    %82 = vector.load %arg9[%c0_37, %c0_38] : memref<96x3xf32, #tpu.memory_space<vmem>>, vector<96x3xf32>
    %cst_39 = arith.constant dense<0.000000e+00> : vector<32x3xf32>
    %83 = tpu.matmul %75, %82, %cst_39 {dimension_numbers = #tpu.dot_dimension_numbers<[1], [0], [0], [1], [0, 0, 1, 1], [], []>} : vector<32x96xf32>, vector<96x3xf32>, vector<32x3xf32> -> vector<32x3xf32>
    %c0_40 = arith.constant 0 : index
    %c0_41 = arith.constant 0 : index
    %84 = vector.load %arg10[%c0_40, %c0_41] : memref<1x3xf32, #tpu.memory_space<vmem>>, vector<1x3xf32>
    %85 = vector.broadcast %84 : vector<1x3xf32> to vector<32x3xf32>
    %86 = arith.addf %83, %85 : vector<32x3xf32>
    %c0_42 = arith.constant 0 : index
    %c0_43 = arith.constant 0 : index
    %87 = vector.load %arg12[%c0_42, %c0_43] : memref<32x3xf32, #tpu.memory_space<vmem>>, vector<32x3xf32>
    tpu.vector_store %arg12[%c0_42, %c0_43], %86 {strides = array<i32>} : memref<32x3xf32, #tpu.memory_space<vmem>>, vector<32x3xf32>,
    return
  }
}

</mosaic_0001>

<bundles_post_ra>
// kernel: ssd_forward.1
= control target key start
LH: loop header
LB: loop body
LE: loop exit
PB: predicated region body
PF: predicated region fallthrough
CT: control target
= control target key end

     0   :  { %v40_v0 = vlaneseq  ;;  %s718_s27 = smov 4   ;;  %v720_v17 = vmov 0.0   ;;  %vm208_vm4 = vcmask 1043456   ;;  %vm179_vm6 = vcmask 31744   ;;  %s721_s17 = smov 32   ;;  %s1197_s0 = inlined_call_operand.vmem [shape: f32[2,16,4], index: 0, kind: input, shape index: {}]   ;;  %s1198_s2 = inlined_call_operand.vmem [shape: f32[1,32], index: 2, kind: input, shape index: {}]   ;;  %s1199_s1 = inlined_call_operand.vmem [shape: f32[12,32], index: 1, kind: input, shape index: {}]   ;;  %s1200_s4 = inlined_call_operand.vmem [shape: f32[1,32], index: 4, kind: input, shape index: {}]   ;;  %s1201_s3 = inlined_call_operand.vmem [shape: f32[96,32], index: 3, kind: input, shape index: {}]   ;;  %s1202_s5 = inlined_call_operand.vmem [shape: f32[96,32], index: 5, kind: input, shape index: {}]   ;;  %s1203_s6 = inlined_call_operand.vmem [shape: f32[1,32], index: 6, kind: input, shape index: {}]   ;;  %s1204_s10 = inlined_call_operand.vmem [shape: f32[1,3], index: 10, kind: input, shape index: {}]   ;;  %s1205_s7 = inlined_call_operand.vmem [shape: f32[96,3], index: 7, kind: input, shape index: {}]   ;;  %s1206_s9 = inlined_call_operand.vmem [shape: f32[96,3], index: 9, kind: input, shape index: {}]   ;;  %s1207_s8 = inlined_call_operand.vmem [shape: f32[1,3], index: 8, kind: input, shape index: {}]   ;;  %s1208_s12 = inlined_call_operand.vmem [shape: f32[32,3], index: 12, kind: output, shape index: {1}]   ;;  %s1209_s11 = inlined_call_operand.vmem [shape: f32[32,3], index: 11, kind: output, shape index: {0}]  }
   0x1   :  { %v117_v1 = vld [vmem:[%s1197_s0] sm:$0xff]  ;;  %v794_v2 = vld [vmem:[%s1197_s0 + $0x10] sm:$0xff]  ;;  %v799_v3 = vld [vmem:[%s1197_s0 + $0x8] sm:$0xff]  ;;  %vm184_vm7 = vcmask 64512   ;;  %vm195_vm8 = vcmask 97280   ;;  %vm301_vm10 = vcmask 261120  }
   0x2   :  { %151 = vrot.lane.b32.xlu0 %v117_v1, %s718_s27  ;;  %153 = vrot.lane.b32.xlu1 %v799_v3, %s718_s27  ;;  %v134_v4 = vrot.slane %v117_v1, 1  ;;  %v135_v5 = vrot.slane %v799_v3, 1  ;;  %v805_v6 = vshrl.u32 %v40_v0, 7  ;;  %v810_v7 = vld [vmem:[%s1197_s0 + $0x18] sm:$0xff]  ;;  %v136_v8 = vrot.slane %v794_v2, 1  ;;  %s719_s0 = smov 8  }
   0x3   :  { %155 = vrot.lane.b32.xlu2 %v794_v2, %s718_s27  ;;  %v137_v11 = vrot.slane %v810_v7, 1  ;;  %v121_v23 = vrot.slane %v117_v1, 7  ;;  %v124_v24 = vrot.slane %v810_v7, 7  ;;  %v122_v25 = vrot.slane %v799_v3, 7  ;;  %v190_v28 = vld [vmem:[%s1199_s1 + $0x8] sm:$0xf] }
   0x4   :  { %vm138_vm0 = vcmp.lt.s32.totalorder %v805_v6, 7  ;;  %v42_v9 = vadd.s32 8, %v805_v6  ;;  %v44_v10 = vadd.s32 24, %v805_v6  ;;  %vm125_vm3 = vcmp.lt.s32.totalorder %v805_v6, 1  ;;  %685 = vmatpush.msk.msra.mxu0 %vm208_vm4, %v190_v28  ;;  %706 = vmatpush.msk.msra.mxu1 %vm208_vm4, %v190_v28  ;;  %v189_v29 = vld [vmem:[%s1199_s1] sm:$0xff]  ;;  %v320_v28 = vld [vmem:[%s1201_s3 + $0x48] sm:$0xff] }
   0x5   :  { %v141_v12 = vsel %vm138_vm0, %v134_v4, %v135_v5  ;;  %v140_v15 = vsel %vm138_vm0, %v135_v5, %v136_v8  ;;  %v139_v16 = vsel %vm138_vm0, %v136_v8, %v137_v11  ;;  %v142_v21 = vsel %vm138_vm0, %v137_v11, %v134_v4  ;;  %v713_v56 = vld [vmem:[%s1198_s2] ss:$0 sm:$0xff]  ;;  %s722_s2 = smov 64  }
   0x6   :  { %v56_v13 = vand.u32 15, %v42_v9  ;;  %v70_v14 = vand.u32 15, %v44_v10  ;;  %v129_v26 = vsel %vm125_vm3, %v124_v24, %v121_v23  ;;  %v128_v27 = vsel %vm125_vm3, %v121_v23, %v122_v25  ;;  %227 = vmatpush.msra.mxu0 %v189_v29  ;;  %707 = vmatpush.msra.mxu1 %v189_v29  ;;  %v319_v29 = vld [vmem:[%s1201_s3 + $0x40] sm:$0xff] }
   0x7   :  { %v49_v30 = vand.u32 15, %v805_v6  ;;  %v43_v34 = vadd.s32 16, %v805_v6  ;;  %v123_v41 = vrot.slane %v794_v2, 7  ;;  %vm327_vm11 = vcmask 785408   ;;  %v572_v6 = vld [vmem:[%s1205_s7 + $0x50] sm:$0xff] }
   0x8   :  { %vm106_vm1 = vcmp.ne.s32.totalorder %v56_v13, 15  ;;  %vm108_vm2 = vcmp.ne.s32.totalorder %v70_v14, 15  ;;  %vm306_vm12 = vcmask 523264   ;;  %vm619_vm13 = vcmask 23552  }
   0x9   :  { %v825_v18 = vsel %vm106_vm1, 1.0, %v720_v17  ;;  %v828_v20 = vsel %vm108_vm2, 1.0, %v720_v17  ;;  %vm93_vm5 = vcmp.ne.s32.totalorder %v49_v30, 0  ;;  %v63_v36 = vand.u32 15, %v43_v34  ;;  %v318_v30 = vld [vmem:[%s1201_s3 + $0x38] sm:$0xff]  ;;  %v315_v34 = vld [vmem:[%s1201_s3 + $0x20] sm:$0xff] }
   0xa   :  { %167 = vrot.lane.b32.xlu0 %v141_v12, %s719_s0  ;;  %v144_v19 = vmul.f32 %v825_v18, %v140_v15  ;;  %v146_v22 = vmul.f32 %v828_v20, %v142_v21  ;;  %v849_v32 = vsel %vm93_vm5, 1.0, %v720_v17  ;;  %v127_v44 = vsel %vm125_vm3, %v122_v25, %v123_v41 }
   0xb   :  { %171 = vrot.lane.b32.xlu2 %v139_v16, %s719_s0  ;;  %v130_v35 = vmul.f32 %v849_v32, %v129_v26  ;;  %vm95_vm9 = vcmp.ne.s32.totalorder %v63_v36, 0  ;;  %v126_v46 = vsel %vm125_vm3, %v123_v41, %v124_v24  ;;  %v322_v26 = vld [vmem:[%s1201_s3 + $0x58] sm:$0xff]  ;;  %v313_v36 = vld [vmem:[%s1201_s3 + $0x10] sm:$0xff] }
   0xc   :  { %169 = vrot.lane.b32.xlu1 %v144_v19, %s719_s0  ;;  %v857_v43 = vsel %vm95_vm9, 1.0, %v720_v17  ;;  %344 = vmatpush.msrb.mxu1 %v322_v26 }
   0xd   :  { %v132_v47 = vmul.f32 %v857_v43, %v127_v44 }
  0x12   :  { %157 = vrot.lane.b32.xlu0 %v810_v7, %s718_s27 }
  0x14   :  { %173 = vrot.lane.b32.xlu1 %v146_v22, %s719_s0 }
  0x5d   :  { %v156_v40 = vpop.permute.xlu2 %155 }
  0x5e   :  { %v182_v52 = vsel %vm179_vm6, %v132_v47, %v156_v40 }
  0x65   :  { %v172_v54 = vpop.permute.xlu2 %171 }
  0x66   :  { %v187_v55 = vsel %vm184_vm7, %v182_v52, %v172_v54 }
  0x74   :  { %v152_v31 = vpop.permute.xlu0 %151  ;;  %v154_v33 = vpop.permute.xlu1 %153 }
  0x75   :  { %v180_v37 = vsel %vm179_vm6, %v130_v35, %v152_v31  ;;  %v181_v45 = vsel %vm179_vm6, %v128_v27, %v154_v33  ;;  %v321_v27 = vld [vmem:[%s1201_s3 + $0x50] sm:$0xff]  ;;  %v316_v33 = vld [vmem:[%s1201_s3 + $0x28] sm:$0xff]  ;;  %v314_v35 = vld [vmem:[%s1201_s3 + $0x18] sm:$0xff] }
  0x76   :  { %345 = vmatpush.msrb.mxu1 %v321_v27  ;;  %v317_v31 = vld [vmem:[%s1201_s3 + $0x30] sm:$0xff] }
  0x78   :  { %346 = vmatpush.msrb.mxu1 %v320_v28 }
  0x7a   :  { %347 = vmatpush.msrb.mxu1 %v319_v29 }
  0x7c   :  { %v168_v38 = vpop.permute.xlu0 %167  ;;  %348 = vmatpush.msrb.mxu1 %v318_v30 }
  0x7d   :  { %v185_v39 = vsel %vm184_vm7, %v180_v37, %v168_v38  ;;  %v312_v37 = vld [vmem:[%s1201_s3 + $0x8] sm:$0xff]  ;;  %v311_v38 = vld [vmem:[%s1201_s3] sm:$0xff] }
  0x7e   :  { %686 = vmatmul.msk.f32.vlgmr.msra.gmra.mxu0 %vm195_vm8, %v185_v39  ;;  %v170_v42 = vpop.permute.xlu1 %169  ;;  %349 = vmatpush.msrb.mxu1 %v317_v31 }
  0x7f   :  { %v186_v50 = vsel %vm184_vm7, %v181_v45, %v170_v42 }
  0x80   :  { %350 = vmatpush.msrb.mxu1 %v316_v33  ;;  %v444_v33 = vld [vmem:[%s1202_s5 + $0x38] sm:$0xff] }
  0x82   :  { %351 = vmatpush.msrb.mxu1 %v315_v34  ;;  %v443_v34 = vld [vmem:[%s1202_s5 + $0x30] sm:$0xff] }
  0x84   :  { %v158_v48 = vpop.permute.xlu0 %157  ;;  %352 = vmatpush.msrb.mxu1 %v314_v35  ;;  %v442_v35 = vld [vmem:[%s1202_s5 + $0x28] sm:$0xff] }
  0x85   :  { %v183_v49 = vsel %vm179_vm6, %v126_v46, %v158_v48 }
  0x86   :  { %687 = vmatmul.msk.f32.gmra.mxu0 %vm195_vm8, %v186_v50  ;;  %v174_v51 = vpop.permute.xlu1 %173  ;;  %353 = vmatpush.msrb.mxu1 %v313_v36  ;;  %v441_v36 = vld [vmem:[%s1202_s5 + $0x20] sm:$0xff] }
  0x87   :  { %v188_v53 = vsel %vm184_vm7, %v183_v49, %v174_v51 }
  0x88   :  { %689 = vmatmul.msk.f32.vlgmr.msra.gmra.mxu1 %vm195_vm8, %v188_v53 }
  0x89   :  { %354 = vmatpush.msrb.mxu1 %v312_v37  ;;  %v440_v37 = vld [vmem:[%s1202_s5 + $0x18] sm:$0xff] }
  0x8b   :  { %355 = vmatpush.msrb.mxu1 %v311_v38  ;;  %v439_v38 = vld [vmem:[%s1202_s5 + $0x10] sm:$0xff] }
  0x8e   :  { %688 = vmatmul.msk.f32.gmra.mxu0 %vm195_vm8, %v187_v55 }
  0xfb   :  { %v229_v57 = vpop.f32.mrf.mxu0 }
  0xfc   :  { %v230_v58 = vadd.f32 %v713_v56, %v229_v57 }
  0xfe   :  { %v241_v59 = vmax.f32 %v230_v58, 0.0  ;;  %v714_v58 = vld [vmem:[%s1200_s4] ss:$0 sm:$0xff] }
 0x100   :  { %273 = vrot.lane.b32.xlu2 %v241_v59, %s721_s17  ;;  %v245_v1 = vrot.slane %v241_v59, 7  ;;  %v257_v2 = vrot.slane %v241_v59, 1 }
 0x103   :  { %v232_v60 = vpop.f32.mrf.mxu0 }
 0x104   :  { %v233_v61 = vadd.f32 %v713_v56, %v232_v60 }
 0x105   :  { %v238_v63 = vpop.f32.mrf.mxu1 }
 0x106   :  { %v242_v62 = vmax.f32 %v233_v61, 0.0  ;;  %v239_v0 = vadd.f32 %v713_v56, %v238_v63  ;;  %v448_v61 = vld [vmem:[%s1202_s5 + $0x58] sm:$0xff] }
 0x107   :  { %469 = vmatpush.msra.mxu2 %v448_v61 }
 0x108   :  { %v246_v3 = vrot.slane %v242_v62, 7  ;;  %v258_v4 = vrot.slane %v242_v62, 1  ;;  %275 = vrot.lane.b32.xlu1 %v242_v62, %s721_s17  ;;  %v244_v5 = vmax.f32 %v239_v0, 0.0  ;;  %v447_v62 = vld [vmem:[%s1202_s5 + $0x50] sm:$0xff]  ;;  %v446_v0 = vld [vmem:[%s1202_s5 + $0x48] sm:$0xff] }
 0x109   :  { %470 = vmatpush.msra.mxu2 %v447_v62 }
 0x10a   :  { %v263_v7 = vsel %vm138_vm0, %v257_v2, %v258_v4  ;;  %v251_v8 = vsel %vm125_vm3, %v245_v1, %v246_v3  ;;  %v248_v9 = vrot.slane %v244_v5, 7  ;;  %v260_v14 = vrot.slane %v244_v5, 1 }
 0x10b   :  { %v235_v10 = vpop.f32.mrf.mxu0  ;;  %289 = vrot.lane.b32.xlu0 %v263_v7, %s722_s2  ;;  %471 = vmatpush.msra.mxu2 %v446_v0 }
 0x10c   :  { %v236_v11 = vadd.f32 %v713_v56, %v235_v10  ;;  %v252_v12 = vsel %vm125_vm3, %v248_v9, %v245_v1  ;;  %v264_v24 = vsel %vm138_vm0, %v260_v14, %v257_v2  ;;  %v445_v1 = vld [vmem:[%s1202_s5 + $0x40] sm:$0xff] }
 0x10d   :  { %v268_v25 = vmul.f32 %v828_v20, %v264_v24  ;;  %v253_v40 = vmul.f32 %v849_v32, %v252_v12  ;;  %472 = vmatpush.msra.mxu2 %v445_v1 }
 0x10e   :  { %v243_v13 = vmax.f32 %v236_v11, 0.0 }
 0x10f   :  { %473 = vmatpush.msra.mxu2 %v444_v33  ;;  %v633_v33 = vld [vmem:[%s1206_s9 + $0x48] sm:$0xff] }
 0x110   :  { %v247_v15 = vrot.slane %v243_v13, 7  ;;  %v259_v16 = vrot.slane %v243_v13, 1 }
 0x111   :  { %474 = vmatpush.msra.mxu2 %v443_v34  ;;  %v570_v34 = vld [vmem:[%s1205_s7 + $0x40] sm:$0xff] }
 0x112   :  { %v261_v17 = vsel %vm138_vm0, %v259_v16, %v260_v14  ;;  %v262_v19 = vsel %vm138_vm0, %v258_v4, %v259_v16  ;;  %v249_v21 = vsel %vm125_vm3, %v247_v15, %v248_v9  ;;  %v250_v22 = vsel %vm125_vm3, %v246_v3, %v247_v15 }
 0x113   :  { %277 = vrot.lane.b32.xlu0 %v243_v13, %s721_s17  ;;  %293 = vrot.lane.b32.xlu1 %v261_v17, %s722_s2  ;;  %v266_v23 = vmul.f32 %v825_v18, %v262_v19  ;;  %v255_v50 = vmul.f32 %v857_v43, %v250_v22 }
 0x114   :  { %475 = vmatpush.msra.mxu2 %v442_v35  ;;  %v632_v35 = vld [vmem:[%s1206_s9 + $0x40] sm:$0xff] }
 0x115   :  { %291 = vrot.lane.b32.xlu2 %v266_v23, %s722_s2 }
 0x116   :  { %476 = vmatpush.msra.mxu2 %v441_v36  ;;  %v569_v36 = vld [vmem:[%s1205_s7 + $0x38] sm:$0xff] }
 0x118   :  { %477 = vmatpush.msra.mxu2 %v440_v37  ;;  %v631_v37 = vld [vmem:[%s1206_s9 + $0x38] sm:$0xff] }
 0x11a   :  { %478 = vmatpush.msra.mxu2 %v439_v38  ;;  %v568_v38 = vld [vmem:[%s1205_s7 + $0x30] sm:$0xff] }
 0x11b   :  { %295 = vrot.lane.b32.xlu0 %v268_v25, %s722_s2 }
 0x11d   :  { %279 = vrot.lane.b32.xlu2 %v244_v5, %s721_s17 }
 0x15a   :  { %v274_v39 = vpop.permute.xlu2 %273 }
 0x15b   :  { %v302_v41 = vsel %vm301_vm10, %v253_v40, %v274_v39  ;;  %v438_v39 = vld [vmem:[%s1202_s5 + $0x8] sm:$0xff]  ;;  %v437_v40 = vld [vmem:[%s1202_s5] sm:$0xff] }
 0x15c   :  { %479 = vmatpush.msra.mxu2 %v438_v39  ;;  %v630_v39 = vld [vmem:[%s1206_s9 + $0x30] sm:$0xff] }
 0x15e   :  { %480 = vmatpush.msra.mxu2 %v437_v40  ;;  %v567_v40 = vld [vmem:[%s1205_s7 + $0x28] sm:$0xff] }
 0x16f   :  { %v292_v47 = vpop.permute.xlu2 %291 }
 0x177   :  { %v280_v54 = vpop.permute.xlu2 %279 }
 0x178   :  { %v305_v56 = vsel %vm301_vm10, %v249_v21, %v280_v54 }
 0x17a   :  { %v276_v45 = vpop.permute.xlu1 %275 }
 0x17b   :  { %v303_v46 = vsel %vm301_vm10, %v251_v8, %v276_v45 }
 0x17c   :  { %v308_v48 = vsel %vm306_vm12, %v303_v46, %v292_v47 }
 0x17d   :  { %v290_v42 = vpop.permute.xlu0 %289 }
 0x17e   :  { %v307_v44 = vsel %vm306_vm12, %v302_v41, %v290_v42 }
 0x17f   :  { %690 = vmatmul.msk.f32.vlgmr.msrb.gmra.mxu1 %vm327_vm11, %v307_v44 }
 0x185   :  { %v278_v49 = vpop.permute.xlu0 %277  ;;  %v294_v52 = vpop.permute.xlu1 %293 }
 0x186   :  { %v304_v51 = vsel %vm301_vm10, %v255_v50, %v278_v49 }
 0x187   :  { %691 = vmatmul.msk.f32.gmra.mxu1 %vm327_vm11, %v308_v48  ;;  %v309_v53 = vsel %vm306_vm12, %v304_v51, %v294_v52 }
 0x18d   :  { %v296_v55 = vpop.permute.xlu0 %295 }
 0x18e   :  { %v310_v57 = vsel %vm306_vm12, %v305_v56, %v296_v55 }
 0x18f   :  { %692 = vmatmul.msk.f32.gmra.mxu1 %vm327_vm11, %v309_v53 }
 0x197   :  { %693 = vmatmul.msk.f32.gmra.mxu1 %vm327_vm11, %v310_v57 }
 0x1fc   :  { %v357_v59 = vpop.f32.mrf.mxu1 }
 0x1fd   :  { %v358_v60 = vadd.f32 %v714_v58, %v357_v59 }
 0x1ff   :  { %v369_v63 = vmax.f32 %v358_v60, 0.0  ;;  %v715_v60 = vld [vmem:[%s1203_s6] ss:$0 sm:$0xff] }
 0x201   :  { %401 = vrot.lane.b32.xlu1 %v369_v63, %s721_s17  ;;  %v373_v5 = vrot.slane %v369_v63, 7  ;;  %v385_v7 = vrot.slane %v369_v63, 1 }
 0x204   :  { %v360_v2 = vpop.f32.mrf.mxu1 }
 0x205   :  { %v361_v3 = vadd.f32 %v714_v58, %v360_v2 }
 0x207   :  { %v370_v4 = vmax.f32 %v361_v3, 0.0 }
 0x209   :  { %v374_v8 = vrot.slane %v370_v4, 7  ;;  %v386_v9 = vrot.slane %v370_v4, 1  ;;  %403 = vrot.lane.b32.xlu0 %v370_v4, %s721_s17 }
 0x20b   :  { %v391_v10 = vsel %vm138_vm0, %v385_v7, %v386_v9  ;;  %v379_v11 = vsel %vm125_vm3, %v373_v5, %v374_v8 }
 0x20c   :  { %417 = vrot.lane.b32.xlu2 %v391_v10, %s722_s2  ;;  %v363_v12 = vpop.f32.mrf.mxu1 }
 0x20d   :  { %v364_v13 = vadd.f32 %v714_v58, %v363_v12 }
 0x20f   :  { %v371_v14 = vmax.f32 %v364_v13, 0.0 }
 0x211   :  { %v375_v15 = vrot.slane %v371_v14, 7  ;;  %v387_v16 = vrot.slane %v371_v14, 1 }
 0x213   :  { %v390_v17 = vsel %vm138_vm0, %v386_v9, %v387_v16  ;;  %v378_v19 = vsel %vm125_vm3, %v374_v8, %v375_v15 }
 0x214   :  { %v366_v21 = vpop.f32.mrf.mxu1  ;;  %405 = vrot.lane.b32.xlu2 %v371_v14, %s721_s17  ;;  %v394_v22 = vmul.f32 %v825_v18, %v390_v17  ;;  %v383_v52 = vmul.f32 %v857_v43, %v378_v19 }
 0x215   :  { %v367_v23 = vadd.f32 %v714_v58, %v366_v21 }
 0x216   :  { %419 = vrot.lane.b32.xlu1 %v394_v22, %s722_s2 }
 0x217   :  { %v372_v24 = vmax.f32 %v367_v23, 0.0 }
 0x219   :  { %v376_v25 = vrot.slane %v372_v24, 7  ;;  %v388_v26 = vrot.slane %v372_v24, 1 }
 0x21b   :  { %v389_v27 = vsel %vm138_vm0, %v387_v16, %v388_v26  ;;  %v392_v28 = vsel %vm138_vm0, %v388_v26, %v385_v7  ;;  %v380_v29 = vsel %vm125_vm3, %v376_v25, %v373_v5  ;;  %v377_v30 = vsel %vm125_vm3, %v375_v15, %v376_v25 }
 0x21c   :  { %421 = vrot.lane.b32.xlu0 %v389_v27, %s722_s2  ;;  %v396_v31 = vmul.f32 %v828_v20, %v392_v28  ;;  %v381_v41 = vmul.f32 %v849_v32, %v380_v29  ;;  %v573_v29 = vld [vmem:[%s1205_s7 + $0x58] sm:$0xff] }
 0x21d   :  { %594 = vmatpush.msra.mxu3 %v573_v29 }
 0x21e   :  { %423 = vrot.lane.b32.xlu2 %v396_v31, %s722_s2  ;;  %407 = vrot.lane.b32.xlu1 %v372_v24, %s721_s17  ;;  %v571_v31 = vld [vmem:[%s1205_s7 + $0x48] sm:$0xff] }
 0x21f   :  { %595 = vmatpush.msra.mxu3 %v572_v6 }
 0x221   :  { %596 = vmatpush.msra.mxu3 %v571_v31 }
 0x223   :  { %597 = vmatpush.msra.mxu3 %v570_v34 }
 0x225   :  { %598 = vmatpush.msra.mxu3 %v569_v36 }
 0x227   :  { %599 = vmatpush.msra.mxu3 %v568_v38 }
 0x229   :  { %600 = vmatpush.msra.mxu3 %v567_v40 }
 0x266   :  { %v418_v44 = vpop.permute.xlu2 %417 }
 0x26e   :  { %v406_v51 = vpop.permute.xlu2 %405 }
 0x26f   :  { %v431_v54 = vsel %vm301_vm10, %v383_v52, %v406_v51  ;;  %v562_v51 = vld [vmem:[%s1205_s7] sm:$0xff] }
 0x270   :  { %v624_v52 = vld [vmem:[%s1206_s9] sm:$0xff] }
 0x273   :  { %v402_v42 = vpop.permute.xlu1 %401 }
 0x274   :  { %v429_v45 = vsel %vm301_vm10, %v381_v41, %v402_v42  ;;  %v629_v41 = vld [vmem:[%s1206_s9 + $0x28] sm:$0xff]  ;;  %v566_v42 = vld [vmem:[%s1205_s7 + $0x20] sm:$0xff] }
 0x275   :  { %v433_v46 = vsel %vm306_vm12, %v429_v45, %v418_v44  ;;  %v628_v44 = vld [vmem:[%s1206_s9 + $0x20] sm:$0xff]  ;;  %v565_v45 = vld [vmem:[%s1205_s7 + $0x18] sm:$0xff]  ;;  %601 = vmatpush.msra.mxu3 %v566_v42 }
 0x276   :  { %694 = vmatmul.msk.f32.vlgmr.msra.gmra.mxu2 %vm327_vm11, %v433_v46  ;;  %v627_v46 = vld [vmem:[%s1206_s9 + $0x18] sm:$0xff] }
 0x277   :  { %602 = vmatpush.msra.mxu3 %v565_v45 }
 0x278   :  { %v424_v58 = vpop.permute.xlu2 %423 }
 0x27b   :  { %v404_v47 = vpop.permute.xlu0 %403 }
 0x27c   :  { %v430_v48 = vsel %vm301_vm10, %v379_v11, %v404_v47  ;;  %v564_v47 = vld [vmem:[%s1205_s7 + $0x10] sm:$0xff] }
 0x27d   :  { %603 = vmatpush.msra.mxu3 %v564_v47 }
 0x288   :  { %v420_v49 = vpop.permute.xlu1 %419 }
 0x289   :  { %v434_v50 = vsel %vm306_vm12, %v430_v48, %v420_v49  ;;  %v626_v48 = vld [vmem:[%s1206_s9 + $0x10] sm:$0xff]  ;;  %v563_v49 = vld [vmem:[%s1205_s7 + $0x8] sm:$0xff] }
 0x28a   :  { %695 = vmatmul.msk.f32.gmra.mxu2 %vm327_vm11, %v434_v50  ;;  %v625_v50 = vld [vmem:[%s1206_s9 + $0x8] sm:$0xff]  ;;  %604 = vmatpush.msra.mxu3 %v563_v49 }
 0x28c   :  { %605 = vmatpush.msra.mxu3 %v562_v51 }
 0x28e   :  { %v422_v53 = vpop.permute.xlu0 %421 }
 0x28f   :  { %v435_v55 = vsel %vm306_vm12, %v431_v54, %v422_v53 }
 0x290   :  { %v408_v56 = vpop.permute.xlu1 %407 }
 0x291   :  { %v432_v57 = vsel %vm301_vm10, %v377_v30, %v408_v56  ;;  %v635_v30 = vld [vmem:[%s1206_s9 + $0x58] sm:$0xff] }
 0x292   :  { %696 = vmatmul.msk.f32.gmra.mxu2 %vm327_vm11, %v435_v55  ;;  %v436_v59 = vsel %vm306_vm12, %v432_v57, %v424_v58  ;;  %644 = vmatpush.msrb.mxu0 %v635_v30 }
 0x29a   :  { %697 = vmatmul.msk.f32.gmra.mxu2 %vm327_vm11, %v436_v59 }
 0x2f9   :  { %v482_v61 = vpop.f32.mrf.mxu2 }
 0x2fa   :  { %v483_v62 = vadd.f32 %v715_v60, %v482_v61 }
 0x2fc   :  { %v494_v63 = vmax.f32 %v483_v62, 0.0 }
 0x2fe   :  { %526 = vrot.lane.b32.xlu0 %v494_v63, %s721_s17  ;;  %v498_v3 = vrot.slane %v494_v63, 7  ;;  %v510_v4 = vrot.slane %v494_v63, 1 }
 0x30d   :  { %v485_v0 = vpop.f32.mrf.mxu2 }
 0x30e   :  { %v486_v1 = vadd.f32 %v715_v60, %v485_v0 }
 0x310   :  { %v495_v2 = vmax.f32 %v486_v1, 0.0 }
 0x312   :  { %v499_v5 = vrot.slane %v495_v2, 7  ;;  %v511_v7 = vrot.slane %v495_v2, 1  ;;  %528 = vrot.lane.b32.xlu2 %v495_v2, %s721_s17 }
 0x314   :  { %v516_v8 = vsel %vm138_vm0, %v510_v4, %v511_v7  ;;  %v1040_v9 = vsel %vm125_vm3, %v498_v3, %v499_v5 }
 0x315   :  { %542 = vrot.lane.b32.xlu1 %v516_v8, %s722_s2  ;;  %v488_v10 = vpop.f32.mrf.mxu2 }
 0x316   :  { %v489_v11 = vadd.f32 %v715_v60, %v488_v10 }
 0x318   :  { %v496_v12 = vmax.f32 %v489_v11, 0.0 }
 0x31a   :  { %v500_v13 = vrot.slane %v496_v12, 7  ;;  %v512_v14 = vrot.slane %v496_v12, 1 }
 0x31c   :  { %v515_v15 = vsel %vm138_vm0, %v511_v7, %v512_v14  ;;  %v1047_v16 = vsel %vm125_vm3, %v499_v5, %v500_v13 }
 0x31d   :  { %530 = vrot.lane.b32.xlu1 %v496_v12, %s721_s17  ;;  %v491_v17 = vpop.f32.mrf.mxu2  ;;  %v519_v19 = vmul.f32 %v825_v18, %v515_v15  ;;  %v508_v62 = vmul.f32 %v857_v43, %v1047_v16  ;;  %v716_v43 = vld [vmem:[%s1204_s10] ss:$0 sm:$0xff] }
 0x31e   :  { %v492_v21 = vadd.f32 %v715_v60, %v491_v17 }
 0x31f   :  { %544 = vrot.lane.b32.xlu0 %v519_v19, %s722_s2 }
 0x320   :  { %v497_v22 = vmax.f32 %v492_v21, 0.0 }
 0x322   :  { %v501_v23 = vrot.slane %v497_v22, 7  ;;  %v513_v24 = vrot.slane %v497_v22, 1 }
 0x324   :  { %v514_v25 = vsel %vm138_vm0, %v512_v14, %v513_v24  ;;  %v517_v26 = vsel %vm138_vm0, %v513_v24, %v510_v4  ;;  %v505_v27 = vsel %vm125_vm3, %v501_v23, %v498_v3  ;;  %v1060_v28 = vsel %vm125_vm3, %v500_v13, %v501_v23 }
 0x325   :  { %546 = vrot.lane.b32.xlu2 %v514_v25, %s722_s2  ;;  %v521_v18 = vmul.f32 %v828_v20, %v517_v26  ;;  %v634_v20 = vld [vmem:[%s1206_s9 + $0x50] sm:$0xff]  ;;  %v506_v54 = vmul.f32 %v849_v32, %v505_v27 }
 0x326   :  { %645 = vmatpush.msrb.mxu0 %v634_v20 }
 0x327   :  { %532 = vrot.lane.b32.xlu0 %v497_v22, %s721_s17  ;;  %548 = vrot.lane.b32.xlu1 %v521_v18, %s722_s2 }
 0x328   :  { %646 = vmatpush.msrb.mxu0 %v633_v33 }
 0x32a   :  { %647 = vmatpush.msrb.mxu0 %v632_v35 }
 0x32c   :  { %648 = vmatpush.msrb.mxu0 %v631_v37 }
 0x32e   :  { %649 = vmatpush.msrb.mxu0 %v630_v39 }
 0x330   :  { %650 = vmatpush.msrb.mxu0 %v629_v41 }
 0x332   :  { %651 = vmatpush.msrb.mxu0 %v628_v44 }
 0x334   :  { %652 = vmatpush.msrb.mxu0 %v627_v46 }
 0x336   :  { %653 = vmatpush.msrb.mxu0 %v626_v48 }
 0x338   :  { %654 = vmatpush.msrb.mxu0 %v625_v50 }
 0x33a   :  { %655 = vmatpush.msrb.mxu0 %v624_v52 }
 0x36c   :  { %v529_v58 = vpop.permute.xlu2 %528 }
 0x36d   :  { %v555_v59 = vsel %vm301_vm10, %v1040_v9, %v529_v58  ;;  %v717_v9 = vld [vmem:[%s1207_s8] ss:$0 sm:$0xff] }
 0x370   :  { %v527_v53 = vpop.permute.xlu0 %526 }
 0x371   :  { %v554_v55 = vsel %vm301_vm10, %v506_v54, %v527_v53 }
 0x37f   :  { %v547_v0 = vpop.permute.xlu2 %546 }
 0x387   :  { %v543_v56 = vpop.permute.xlu1 %542 }
 0x388   :  { %v558_v57 = vsel %vm306_vm12, %v554_v55, %v543_v56 }
 0x389   :  { %698 = vmatmul.msk.f32.vlgmr.msra.gmra.mxu3 %vm327_vm11, %v558_v57  ;;  %702 = vmatmul.msk.f32.vlgmr.msrb.gmra.mxu0 %vm327_vm11, %v558_v57 }
 0x38f   :  { %v531_v32 = vpop.permute.xlu1 %530 }
 0x390   :  { %v556_v63 = vsel %vm301_vm10, %v508_v62, %v531_v32 }
 0x391   :  { %v545_v60 = vpop.permute.xlu0 %544  ;;  %v560_v1 = vsel %vm306_vm12, %v556_v63, %v547_v0 }
 0x392   :  { %v559_v61 = vsel %vm306_vm12, %v555_v59, %v545_v60 }
 0x393   :  { %699 = vmatmul.msk.f32.gmra.mxu3 %vm327_vm11, %v559_v61  ;;  %703 = vmatmul.msk.f32.gmra.mxu0 %vm327_vm11, %v559_v61 }
 0x399   :  { %v533_v2 = vpop.permute.xlu0 %532  ;;  %v549_v4 = vpop.permute.xlu1 %548 }
 0x39a   :  { %v557_v3 = vsel %vm301_vm10, %v1060_v28, %v533_v2 }
 0x39b   :  { %700 = vmatmul.msk.f32.gmra.mxu3 %vm327_vm11, %v560_v1  ;;  %704 = vmatmul.msk.f32.gmra.mxu0 %vm327_vm11, %v560_v1  ;;  %v561_v5 = vsel %vm306_vm12, %v557_v3, %v549_v4 }
 0x3a3   :  { %701 = vmatmul.msk.f32.gmra.mxu3 %vm327_vm11, %v561_v5  ;;  %705 = vmatmul.msk.f32.gmra.mxu0 %vm327_vm11, %v561_v5 }
 0x406   :  { %v657_v7 = vpop.f32.mrf.mxu0 }
 0x407   :  { %v658_v8 = vadd.f32 %v716_v43, %v657_v7 }
 0x409   :  { %669 = vst.msk [vmem:[%s1208_s12] sm:$0xff] %vm619_vm13, %v658_v8 }
 0x40c   :  { %v607_v10 = vpop.f32.mrf.mxu3 }
 0x40d   :  { %v608_v11 = vadd.f32 %v717_v9, %v607_v10 }
 0x40f   :  { %620 = vst.msk [vmem:[%s1209_s11] sm:$0xff] %vm619_vm13, %v608_v11 }
 0x410   :  { %v660_v12 = vpop.f32.mrf.mxu0 }
 0x411   :  { %v661_v13 = vadd.f32 %v716_v43, %v660_v12 }
 0x413   :  { %670 = vst.msk [vmem:[%s1208_s12 + $0x8] sm:$0xff] %vm619_vm13, %v661_v13 }
 0x416   :  { %v610_v14 = vpop.f32.mrf.mxu3 }
 0x417   :  { %v611_v15 = vadd.f32 %v717_v9, %v610_v14 }
 0x418   :  { %v663_v16 = vpop.f32.mrf.mxu0 }
 0x419   :  { %621 = vst.msk [vmem:[%s1209_s11 + $0x8] sm:$0xff] %vm619_vm13, %v611_v15  ;;  %v664_v17 = vadd.f32 %v716_v43, %v663_v16 }
 0x41b   :  { %671 = vst.msk [vmem:[%s1208_s12 + $0x10] sm:$0xff] %vm619_vm13, %v664_v17 }
 0x41e   :  { %v613_v19 = vpop.f32.mrf.mxu3 }
 0x41f   :  { %v614_v21 = vadd.f32 %v717_v9, %v613_v19 }
 0x420   :  { %v666_v22 = vpop.f32.mrf.mxu0 }
 0x421   :  { %622 = vst.msk [vmem:[%s1209_s11 + $0x10] sm:$0xff] %vm619_vm13, %v614_v21  ;;  %v667_v23 = vadd.f32 %v716_v43, %v666_v22 }
 0x423   :  { %672 = vst.msk [vmem:[%s1208_s12 + $0x18] sm:$0xff] %vm619_vm13, %v667_v23 }
 0x426   :  { %v616_v24 = vpop.f32.mrf.mxu3 }
 0x427   :  { %v617_v25 = vadd.f32 %v717_v9, %v616_v24 }
 0x429   :  { %623 = vst.msk [vmem:[%s1209_s11 + $0x18] sm:$0xff] %vm619_vm13, %v617_v25 }

</bundles_post_ra>
